<compile_context>
chip_gen: v7x
topology: tpu7x:2x2x1
jax: 0.10.0
libtpu: 0.0.40
codegen_flags: <defaults>
</compile_context>

<pallas_src>
import functools

import jax
import jax.numpy as jnp
from jax.experimental import pallas as pl
from jax.experimental.pallas import tpu as pltpu


def _round_up(n, m):
    return ((n + m - 1) // m) * m


def _mlp_fused_kernel(*refs, activations):
    """Whole-MLP forward for one batch tile.

    refs = (x_ref, w0_ref, b0_ref, w1_ref, b1_ref, ..., o_ref)
      x_ref : [TB, In0]      (caller dtype; cast to f32 in-kernel)
      wI_ref: [In_i, Out_i]  (pre-transposed in the wrapper)
      bI_ref: [1, Out_i]
      o_ref : [TB, Out_last]

    Intermediate activations stay in vregs between layers.
    """
    x_ref = refs[0]
    o_ref = refs[-1]

    h = x_ref[...].astype(jnp.float32)  # `x = x.float()` folded into the kernel
    for i, act in enumerate(activations):
        w = refs[1 + 2 * i][...]
        b = refs[2 + 2 * i][...]
        h = jnp.dot(h, w, preferred_element_type=jnp.float32) + b
        if act == "relu":
            h = jnp.maximum(h, 0.0)
        elif act == "sigmoid":
            h = jax.nn.sigmoid(h)
        # (no "none" case for this module: every layer has ReLU or Sigmoid)
    o_ref[...] = h.astype(o_ref.dtype)


def init_net_params(sizes, key):
    """Deterministic init mirroring nn.Linear default: U(-1/sqrt(in), 1/sqrt(in)).

    Stored in PyTorch layout: W [Out, In], b [Out].
    """
    params = []
    for i in range(len(sizes) - 1):
        fan_in, fan_out = sizes[i], sizes[i + 1]
        key, kw, kb = jax.random.split(key, 3)
        bound = 1.0 / jnp.sqrt(jnp.float32(fan_in))
        w = jax.random.uniform(
            kw, (fan_out, fan_in), jnp.float32, minval=-bound, maxval=bound
        )
        b = jax.random.uniform(
            kb, (fan_out,), jnp.float32, minval=-bound, maxval=bound
        )
        params.append((w, b))
    return params


def prepare_params(params):
    """One-time layout plumbing (outside the kernel):
    - transpose W to [In, Out] so the kernel computes x @ W on the MXU,
    - reshape bias to [1, Out] for a clean broadcast add.
    No output padding: the kernel stores the true [TB, Out_last] tile, so the
    wrapper needs no post-slice op.
    """
    prepped = []
    for w, b in params:
        prepped.append(
            (jnp.asarray(w, jnp.float32).T, jnp.asarray(b, jnp.float32).reshape(1, -1))
        )
    return prepped


@functools.partial(jax.jit, static_argnames=("sizes",))
def net_forward(x, prepped_params, sizes):
    """Forward pass of Net(sizes) as ONE fused, batch-gridded Pallas TPU kernel."""
    B = x.shape[0]
    in0 = sizes[0]
    last = sizes[-1]
    n_layers = len(sizes) - 1

    # Matches the PyTorch module: ReLU (+Dropout=identity) unless this is the
    # final layer AND sizes[-1] == 1, in which case Sigmoid.
    activations = tuple(
        "relu" if (i < n_layers - 1 or last > 1) else "sigmoid"
        for i in range(n_layers)
    )

    # ---- batch tiling: TB rows per grid step (multiple of 8 = f32 sublane) ----
    TB = min(_round_up(B, 8), 256)
    grid = (pl.cdiv(B, TB),)

    # ---- explicit VMEM budget (safe on v5e/v6e/v7x; capped at 32 MiB) --------
    weight_bytes = sum(
        int(w.size) * 4 + int(b.size) * 4 for w, b in prepped_params
    )
    io_bytes = 2 * TB * (in0 + last) * 4  # double-buffered x/out tiles
    vmem_limit = min(max(2 * weight_bytes + io_bytes + (4 << 20), 16 << 20), 32 << 20)

    in_specs = [pl.BlockSpec((TB, in0), lambda i: (i, 0))]
    flat_inputs = [x]
    for wt, b2 in prepped_params:
        in_specs.append(pl.BlockSpec(wt.shape, lambda i: (0, 0)))   # resident weight
        in_specs.append(pl.BlockSpec(b2.shape, lambda i: (0, 0)))   # resident bias
        flat_inputs.append(wt)
        flat_inputs.append(b2)

    kernel = functools.partial(_mlp_fused_kernel, activations=activations)

    return pl.pallas_call(
        kernel,
        out_shape=jax.ShapeDtypeStruct((B, last), jnp.float32),
        grid=grid,
        in_specs=in_specs,
        out_specs=pl.BlockSpec((TB, last), lambda i: (i, 0)),
        compiler_params=pltpu.CompilerParams(
            dimension_semantics=("parallel",),
            vmem_limit_bytes=vmem_limit,
        ),
    )(*flat_inputs)


if __name__ == "__main__":
    # Small shapes implied by the MLP: batch=8, sizes=[32, 64, 32, 1]
    sizes = (32, 64, 32, 1)
    batch = 8

    key = jax.random.PRNGKey(0)
    key, k_x, k_p = jax.random.split(key, 3)
    x = jax.random.normal(k_x, (batch, sizes[0]), jnp.float32)

    params = init_net_params(sizes, k_p)  # PyTorch-layout params
    prepped = prepare_params(params)      # [In, Out] weights, [1, Out] biases

    out = net_forward(x, prepped, sizes=sizes)
    out = jax.block_until_ready(out)

    assert out.shape == (batch, sizes[-1])
    assert bool(jnp.all((out >= 0.0) & (out <= 1.0)))  # sigmoid range sanity check
    print("KERNEL_OK")
</pallas_src>

<mosaic_0001>
module attributes {stable_mosaic.version = 11 : i64} {
  func.func @_mlp_fused_kernel(%arg0: i32, %arg1: memref<8x32xf32, #tpu.memory_space<vmem>>, %arg2: memref<32x64xf32, #tpu.memory_space<vmem>>, %arg3: memref<1x64xf32, #tpu.memory_space<vmem>>, %arg4: memref<64x32xf32, #tpu.memory_space<vmem>>, %arg5: memref<1x32xf32, #tpu.memory_space<vmem>>, %arg6: memref<32x1xf32, #tpu.memory_space<vmem>>, %arg7: memref<1x1xf32, #tpu.memory_space<vmem>>, %arg8: memref<8x1xf32, #tpu.memory_space<vmem>>) attributes {dimension_semantics = [#tpu.dimension_semantics<parallel>], iteration_bounds = array<i64: 1>, scalar_prefetch = 0 : i64, scratch_operands = 0 : i64, tpu.core_type = #tpu.core_type<tc>, window_params = [{transform_indices = @transform_0, window_bounds = array<i64: 8, 32>}, {pipeline_mode = #tpu.pipeline_mode<synchronous>, transform_indices = @transform_1, window_bounds = array<i64: 32, 64>}, {pipeline_mode = #tpu.pipeline_mode<synchronous>, transform_indices = @transform_2, window_bounds = array<i64: 1, 64>}, {pipeline_mode = #tpu.pipeline_mode<synchronous>, transform_indices = @transform_3, window_bounds = array<i64: 64, 32>}, {pipeline_mode = #tpu.pipeline_mode<synchronous>, transform_indices = @transform_4, window_bounds = array<i64: 1, 32>}, {pipeline_mode = #tpu.pipeline_mode<synchronous>, transform_indices = @transform_5, window_bounds = array<i64: 32, 1>}, {pipeline_mode = #tpu.pipeline_mode<synchronous>, transform_indices = @transform_6, window_bounds = array<i64: 1, 1>}, {transform_indices = @transform_7, window_bounds = array<i64: 8, 1>}]} {
    %c0 = arith.constant 0 : index
    %c0_0 = arith.constant 0 : index
    %0 = vector.load %arg1[%c0, %c0_0] : memref<8x32xf32, #tpu.memory_space<vmem>>, vector<8x32xf32>
    %c0_1 = arith.constant 0 : index
    %c0_2 = arith.constant 0 : index
    %1 = vector.load %arg2[%c0_1, %c0_2] : memref<32x64xf32, #tpu.memory_space<vmem>>, vector<32x64xf32>
    %c0_3 = arith.constant 0 : index
    %c0_4 = arith.constant 0 : index
    %2 = vector.load %arg3[%c0_3, %c0_4] : memref<1x64xf32, #tpu.memory_space<vmem>>, vector<1x64xf32>
    %cst = arith.constant dense<0.000000e+00> : vector<8x64xf32>
    %3 = tpu.matmul %0, %1, %cst {dimension_numbers = #tpu.dot_dimension_numbers<[1], [0], [0], [1], [0, 0, 1, 1], [], []>} : vector<8x32xf32>, vector<32x64xf32>, vector<8x64xf32> -> vector<8x64xf32>
    %4 = vector.broadcast %2 : vector<1x64xf32> to vector<8x64xf32>
    %5 = arith.addf %3, %4 : vector<8x64xf32>
    %cst_5 = arith.constant 0.000000e+00 : f32
    %6 = vector.broadcast %cst_5 : f32 to vector<8x64xf32>
    %7 = arith.maximumf %5, %6 : vector<8x64xf32>
    %c0_6 = arith.constant 0 : index
    %c0_7 = arith.constant 0 : index
    %8 = vector.load %arg4[%c0_6, %c0_7] : memref<64x32xf32, #tpu.memory_space<vmem>>, vector<64x32xf32>
    %c0_8 = arith.constant 0 : index
    %c0_9 = arith.constant 0 : index
    %9 = vector.load %arg5[%c0_8, %c0_9] : memref<1x32xf32, #tpu.memory_space<vmem>>, vector<1x32xf32>
    %cst_10 = arith.constant dense<0.000000e+00> : vector<8x32xf32>
    %10 = tpu.matmul %7, %8, %cst_10 {dimension_numbers = #tpu.dot_dimension_numbers<[1], [0], [0], [1], [0, 0, 1, 1], [], []>} : vector<8x64xf32>, vector<64x32xf32>, vector<8x32xf32> -> vector<8x32xf32>
    %11 = vector.broadcast %9 : vector<1x32xf32> to vector<8x32xf32>
    %12 = arith.addf %10, %11 : vector<8x32xf32>
    %cst_11 = arith.constant 0.000000e+00 : f32
    %13 = vector.broadcast %cst_11 : f32 to vector<8x32xf32>
    %14 = arith.maximumf %12, %13 : vector<8x32xf32>
    %c0_12 = arith.constant 0 : index
    %c0_13 = arith.constant 0 : index
    %15 = vector.load %arg6[%c0_12, %c0_13] : memref<32x1xf32, #tpu.memory_space<vmem>>, vector<32x1xf32>
    %c0_14 = arith.constant 0 : index
    %c0_15 = arith.constant 0 : index
    %16 = vector.load %arg7[%c0_14, %c0_15] : memref<1x1xf32, #tpu.memory_space<vmem>>, vector<1x1xf32>
    %cst_16 = arith.constant dense<0.000000e+00> : vector<8x1xf32>
    %17 = tpu.matmul %14, %15, %cst_16 {dimension_numbers = #tpu.dot_dimension_numbers<[1], [0], [0], [1], [0, 0, 1, 1], [], []>} : vector<8x32xf32>, vector<32x1xf32>, vector<8x1xf32> -> vector<8x1xf32>
    %18 = vector.broadcast %16 : vector<1x1xf32> to vector<8x1xf32>
    %19 = arith.addf %17, %18 : vector<8x1xf32>
    %20 = arith.negf %19 : vector<8x1xf32>
    %21 = math.exp %20 : vector<8x1xf32>
    %cst_17 = arith.constant 1.000000e+00 : f32
    %22 = vector.broadcast %cst_17 : f32 to vector<8x1xf32>
    %23 = arith.addf %22, %21 : vector<8x1xf32>
    %24 = arith.divf %22, %23 : vector<8x1xf32>
    %c0_18 = arith.constant 0 : index
    %c0_19 = arith.constant 0 : index
    %25 = vector.load %arg8[%c0_18, %c0_19] : memref<8x1xf32, #tpu.memory_space<vmem>>, vector<8x1xf32>
    tpu.vector_store %arg8[%c0_18, %c0_19], %24 {strides = array<i32>} : memref<8x1xf32, #tpu.memory_space<vmem>>, vector<8x1xf32>,
    return
  }
  func.func @transform_0(%arg0: i32) -> (i32, i32) {
    %c0_i32 = arith.constant 0 : i32
    %c0_i32_0 = arith.constant 0 : i32
    return %arg0, %c0_i32 : i32, i32
  }
  func.func @transform_1(%arg0: i32) -> (i32, i32) {
    %c0_i32 = arith.constant 0 : i32
    %c0_i32_0 = arith.constant 0 : i32
    %c0_i32_1 = arith.constant 0 : i32
    return %c0_i32, %c0_i32_0 : i32, i32
  }
  func.func @transform_2(%arg0: i32) -> (i32, i32) {
    %c0_i32 = arith.constant 0 : i32
    %c0_i32_0 = arith.constant 0 : i32
    %c0_i32_1 = arith.constant 0 : i32
    return %c0_i32, %c0_i32_0 : i32, i32
  }
  func.func @transform_3(%arg0: i32) -> (i32, i32) {
    %c0_i32 = arith.constant 0 : i32
    %c0_i32_0 = arith.constant 0 : i32
    %c0_i32_1 = arith.constant 0 : i32
    return %c0_i32, %c0_i32_0 : i32, i32
  }
  func.func @transform_4(%arg0: i32) -> (i32, i32) {
    %c0_i32 = arith.constant 0 : i32
    %c0_i32_0 = arith.constant 0 : i32
    %c0_i32_1 = arith.constant 0 : i32
    return %c0_i32, %c0_i32_0 : i32, i32
  }
  func.func @transform_5(%arg0: i32) -> (i32, i32) {
    %c0_i32 = arith.constant 0 : i32
    %c0_i32_0 = arith.constant 0 : i32
    %c0_i32_1 = arith.constant 0 : i32
    return %c0_i32, %c0_i32_0 : i32, i32
  }
  func.func @transform_6(%arg0: i32) -> (i32, i32) {
    %c0_i32 = arith.constant 0 : i32
    %c0_i32_0 = arith.constant 0 : i32
    %c0_i32_1 = arith.constant 0 : i32
    return %c0_i32, %c0_i32_0 : i32, i32
  }
  func.func @transform_7(%arg0: i32) -> (i32, i32) {
    %c0_i32 = arith.constant 0 : i32
    %c0_i32_0 = arith.constant 0 : i32
    return %arg0, %c0_i32 : i32, i32
  }
}

</mosaic_0001>

<bundles_post_ra>
// kernel: net_forward.1
= control target key start
LH: loop header
LB: loop body
LE: loop exit
PB: predicated region body
PF: predicated region fallthrough
CT: control target
= control target key end

     0   :  { %v399_v0 = vmov 0.0|0.0   ;;  %vm400_vm0 = vmmov 0   ;;  %v401_v4 = vmov 0.0   ;;  %vm40_vm1 = vcmask 261120   ;;  %s510_s1 = inlined_call_operand.vmem [shape: f32[32,64], index: 1, kind: input, shape index: {}]   ;;  %s511_s3 = inlined_call_operand.vmem [shape: f32[64,32], index: 3, kind: input, shape index: {}]   ;;  %s512_s0 = inlined_call_operand.vmem [shape: f32[8,32], index: 0, kind: input, shape index: {}]   ;;  %s513_s5 = inlined_call_operand.vmem [shape: f32[32,1], index: 5, kind: input, shape index: {}]   ;;  %s514_s2 = inlined_call_operand.vmem [shape: f32[1,64], index: 2, kind: input, shape index: {}]   ;;  %s515_s6 = inlined_call_operand.<no memory space> [shape: f32[1,1], index: 6, kind: input, shape index: {}]   ;;  %s516_s4 = inlined_call_operand.vmem [shape: f32[1,32], index: 4, kind: input, shape index: {}]   ;;  %s517_s7 = inlined_call_operand.vmem [shape: f32[8,1], index: 7, kind: output, shape index: {}]  }
   0x1   :  { %368 = vmatprep.subr.bf16.mxu0 %v399_v0  ;;  %v29_v1 = vld [vmem:[%s510_s1] sm:$0xff]  ;;  %v30_v2 = vld [vmem:[%s510_s1 + $0x8] sm:$0xff]  ;;  %v31_v3 = vld [vmem:[%s510_s1 + $0x10] sm:$0xff]  ;;  %335 = vmatprep.mubr.msk.f32.mxu0 %vm400_vm0, %v401_v4  ;;  %vm130_vm2 = vcmask 523264   ;;  %v12_v32 = vstv %s515_s6  ;;  %vm295_vm3 = vcmask 7168  }
   0x2   :  { %v369_v5 = vpack.c.bf16 %v30_v2, %v29_v1  ;;  %v32_v6 = vld [vmem:[%s510_s1 + $0x18] sm:$0xff]  ;;  %374 = vmatprep.subr.bf16.mxu1 %v399_v0  ;;  %v115_v7 = vld [vmem:[%s511_s3] sm:$0xff]  ;;  %354 = vmatprep.mubr.msk.f32.mxu1 %vm400_vm0, %v401_v4  ;;  %v116_v8 = vld [vmem:[%s511_s3 + $0x8] sm:$0xff]  ;;  %13 = vst [vmem:[#allocation2] sm:$0x1] %v12_v32 }
   0x3   :  { %v117_v9 = vld [vmem:[%s511_s3 + $0x10] sm:$0xff]  ;;  %v118_v10 = vld [vmem:[%s511_s3 + $0x18] sm:$0xff]  ;;  %v372_v11 = vpack.c.bf16 %v32_v6, %v31_v3  ;;  %v375_v12 = vpack.c.bf16 %v116_v8, %v115_v7  ;;  %v119_v14 = vld [vmem:[%s511_s3 + $0x20] sm:$0xff] }
   0x4   :  { %370 = vmatpush3.bf16.msra.mxu0 %v369_v5  ;;  %v378_v13 = vpack.c.bf16 %v118_v10, %v117_v9  ;;  %v120_v15 = vld [vmem:[%s511_s3 + $0x28] sm:$0xff]  ;;  %v28_v16 = vld [vmem:[%s512_s0] sm:$0xff]  ;;  %v121_v18 = vld [vmem:[%s511_s3 + $0x30] sm:$0xff] }
   0x5   :  { %371 = vmatprep.subr.bf16.mxu0 %v399_v0  ;;  %376 = vmatpush3.bf16.msra.mxu1 %v375_v12  ;;  %v381_v17 = vpack.c.bf16 %v120_v15, %v119_v14  ;;  %v122_v19 = vld [vmem:[%s511_s3 + $0x38] sm:$0xff]  ;;  %v205_v21 = vld [vmem:[%s513_s5] sm:$0xff]  ;;  %v206_v22 = vld [vmem:[%s513_s5 + $0x8] sm:$0xff] }
   0x6   :  { %377 = vmatprep.subr.bf16.mxu1 %v399_v0  ;;  %v384_v20 = vpack.c.bf16 %v122_v19, %v121_v18  ;;  %v387_v23 = vpack.c.bf16 %v206_v22, %v205_v21  ;;  %v301_v24 = vld [vmem:[%s514_s2] ss:$0 sm:$0xff]  ;;  %v207_v29 = vld [vmem:[%s513_s5 + $0x10] sm:$0xff]  ;;  %v208_v30 = vld [vmem:[%s513_s5 + $0x18] sm:$0xff] }
   0x7   :  { %v390_v31 = vpack.c.bf16 %v208_v30, %v207_v29  ;;  %v303_v33 = vld [vmem:[%s516_s4] ss:$0 sm:$0xff] }
   0x8   :  { %373 = vmatpush3.bf16.msra.mxu0 %v372_v11 }
   0x9   :  { %386 = vmatprep.subr.bf16.mxu0 %v399_v0  ;;  %379 = vmatpush3.bf16.msra.mxu1 %v378_v13  ;;  %v305_v38 = vld [vmem:[#allocation2] ss:$0 sm:$0xff] }
   0xa   :  { %380 = vmatprep.subr.bf16.mxu1 %v399_v0 }
   0xb   :  { %336 = vmatmul.mubr.msk.f32.vlgmr.msra.gmra.mrb[0].mxu0 %vm40_vm1, %v28_v16 }
   0xc   :  { %365 = vmatprep.mubr.msk.f32.mxu0 %vm400_vm0, %v401_v4  ;;  %388 = vmatpush3.bf16.msra.mxu0 %v387_v23 }
   0xd   :  { %382 = vmatpush3.bf16.msra.mxu1 %v381_v17  ;;  %389 = vmatprep.subr.bf16.mxu0 %v399_v0 }
   0xe   :  { %383 = vmatprep.subr.bf16.mxu1 %v399_v0 }
  0x10   :  { %391 = vmatpush3.bf16.msra.mxu0 %v390_v31 }
  0x11   :  { %385 = vmatpush3.bf16.msra.mxu1 %v384_v20 }
  0xde   :  { %v110_v25 = vpop.f32.mrb[0].mxu0 }
  0xdf   :  { %v111_v26 = vadd.f32 %v301_v24, %v110_v25  ;;  %v337_v27 = vpop.f32.mrb[1].mxu0 }
  0xe1   :  { %v114_v28 = vmax.f32 %v111_v26, 0.0 }
  0xe3   :  { %355 = vmatmul.mubr.msk.f32.vlgmr.msra.gmra.mrb[0].mxu1 %vm130_vm2, %v114_v28 }
 0x1b6   :  { %v200_v34 = vpop.f32.mrb[0].mxu1 }
 0x1b7   :  { %v201_v35 = vadd.f32 %v303_v33, %v200_v34  ;;  %v356_v36 = vpop.f32.mrb[1].mxu1 }
 0x1b9   :  { %v204_v37 = vmax.f32 %v201_v35, 0.0 }
 0x1bb   :  { %366 = vmatmul.mubr.msk.f32.vlgmr.msra.gmra.mrb[2].mxu0 %vm40_vm1, %v204_v37 }
 0x28e   :  { %v285_v39 = vpop.f32.mrb[2].mxu0 }
 0x28f   :  { %v286_v40 = vadd.f32 %v305_v38, %v285_v39  ;;  %v367_v41 = vpop.f32.mrb[3].mxu0 }
 0x291   :  { %v307_v42 = vmul.f32 -1.442695, %v286_v40 }
 0x293   :  { %395 = vpow2.f32 %v307_v42 }
 0x29d   :  { %v396_v43 = vpop.eup %395 }
 0x29e   :  { %v292_v44 = vadd.f32 1.0, %v396_v43 }
 0x2a0   :  { %397 = vrcp.f32 %v292_v44 }
 0x2aa   :  { %v398_v45 = vpop.eup %397 }
 0x2ab   :  { %296 = vst.msk [vmem:[%s517_s7] sm:$0xff] %vm295_vm3, %v398_v45 }

</bundles_post_ra>
